<compile_context>
chip_gen: v7x
topology: tpu7x:2x2x1
jax: 0.10.0
libtpu: 0.0.40
codegen_flags: <defaults>
</compile_context>

<pallas_src>
import functools
import math

import jax
import jax.numpy as jnp
from jax import lax
from jax.experimental import pallas as pl
from jax.experimental.pallas import tpu as pltpu


def _min_kernel(num_heads, q_ref, k_ref, wq_ref, bq_ref, wk_ref, bk_ref, min_ref):
    """Per-batch minimum of the raw (pre-mask) attention scores."""
    _, D, N = q_ref.shape
    M = k_ref.shape[2]
    H = num_heads
    dim = D // H
    scale = 1.0 / math.sqrt(dim)

    qp = jnp.dot(wq_ref[...], q_ref[0], preferred_element_type=jnp.float32) + bq_ref[...]
    kp = jnp.dot(wk_ref[...], k_ref[0], preferred_element_type=jnp.float32) + bk_ref[...]
    qh = qp.reshape(H, dim, N)
    kh = kp.reshape(H, dim, M)
    scores = lax.dot_general(qh, kh, (((1,), (1,)), ((0,), (0,))),
                             preferred_element_type=jnp.float32) * scale   # (H, N, M)
    min_ref[...] = jnp.min(scores, keepdims=True)                          # (1, 1, 1)


def _mha_kernel(num_heads, has_mask, compute_dtype, *refs):
    """Per-batch projections, (optionally masked) softmax attention, merge."""
    if has_mask:
        (q_ref, k_ref, v_ref, wq_ref, bq_ref, wk_ref, bk_ref, wv_ref, bv_ref,
         wm_ref, bm_ref, negmask_ref, gmin_ref, out_ref, smean_ref) = refs
    else:
        (q_ref, k_ref, v_ref, wq_ref, bq_ref, wk_ref, bk_ref, wv_ref, bv_ref,
         wm_ref, bm_ref, out_ref, smean_ref) = refs

    _, D, N = q_ref.shape
    M = k_ref.shape[2]
    H = num_heads
    dim = D // H
    scale = 1.0 / math.sqrt(dim)
    cdt = compute_dtype

    # --- 1x1 conv projections: full-depth (D,D)@(D,seq) MXU matmuls ---------
    qp = jnp.dot(wq_ref[...].astype(cdt), q_ref[0].astype(cdt),
                 preferred_element_type=jnp.float32) + bq_ref[...]
    kp = jnp.dot(wk_ref[...].astype(cdt), k_ref[0].astype(cdt),
                 preferred_element_type=jnp.float32) + bk_ref[...]
    vp = jnp.dot(wv_ref[...].astype(cdt), v_ref[0].astype(cdt),
                 preferred_element_type=jnp.float32) + bv_ref[...]

    # head-major channel blocks -> (H, dim, seq); one batched matmul per stage
    qh = qp.reshape(H, dim, N).astype(cdt)
    kh = kp.reshape(H, dim, M).astype(cdt)
    vh = vp.reshape(H, dim, M).astype(cdt)

    scores = lax.dot_general(qh, kh, (((1,), (1,)), ((0,), (0,))),
                             preferred_element_type=jnp.float32) * scale   # (H, N, M)

    if has_mask:
        # additive mask uses the GLOBAL min over all batches/heads (scalar in
        # SMEM), applied once and broadcast over the head axis.
        mask_add = (gmin_ref[0, 0] - 20.0) * negmask_ref[...]              # (N, M)
        scores = scores + mask_add[None, :, :]

    # head-mean of the (masked) scores -> second output
    smean_ref[0] = (jnp.sum(scores, axis=0) * (1.0 / H)).astype(smean_ref.dtype)

    # --- softmax over keys (f32 VPU math, divide on the EUP) ----------------
    smax = jnp.max(scores, axis=-1, keepdims=True)
    e = jnp.exp(scores - smax)
    denom = jnp.sum(e, axis=-1, keepdims=True)
    prob = e * pl.reciprocal(denom, approx=True)

    # --- value weighting (batched over heads) + fused merge 1x1 conv --------
    x = lax.dot_general(vh, prob.astype(cdt), (((2,), (2,)), ((0,), (0,))),
                        preferred_element_type=jnp.float32)                # (H, dim, N)
    x2d = x.reshape(D, N).astype(cdt)
    out = jnp.dot(wm_ref[...].astype(cdt), x2d,
                  preferred_element_type=jnp.float32) + bm_ref[...]
    out_ref[0] = out.astype(out_ref.dtype)


def _vmem_limit_bytes(D, N, M, H):
    f = 4
    blk = 2 * f * (D * N + 2 * D * M)                  # q/k/v blocks, double-buffered
    blk += 2 * f * (4 * D * D + 4 * D)                 # conv weights + biases
    blk += 2 * f * (N * M)                             # negmask
    blk += 2 * f * (D * N + N * M)                     # out + smean blocks
    blk += f * (6 * H * N * M + 4 * D * max(N, M))     # live intermediates
    # floor above v5e's 16 MiB scoped default; cap below v7x's 64 MiB physical
    return int(min(max(3 * blk, 32 * 1024 * 1024), 60 * 1024 * 1024))


def multi_headed_attention(query, key, value, dist, mask, params, num_heads,
                           *, compute_dtype=jnp.float32):
    """Pallas forward of MultiHeadedAttention.  `dist` is unused (as in the
    PyTorch module).  Set compute_dtype=jnp.bfloat16 on v6e/v7x for higher MXU
    throughput (accumulation and all softmax math remain f32)."""
    del dist  # the reference module never uses it
    B, D, N = query.shape
    M = key.shape[2]
    H = num_heads
    dim = D // H

    # PyTorch channel c = d*H + h (from .view(batch, dim, H, -1)); the kernel
    # wants head-major rows r = h*dim + d.  Plain-JAX glue, done once.
    def perm_proj_w(w):
        return w.reshape(dim, H, D).transpose(1, 0, 2).reshape(D, D)

    def perm_proj_b(b):
        return b.reshape(dim, H).transpose(1, 0).reshape(D, 1)

    def perm_merge_w(w):
        return w.reshape(D, dim, H).transpose(0, 2, 1).reshape(D, D)

    f32 = jnp.float32
    wq = perm_proj_w(params["wq"]).astype(f32); bq = perm_proj_b(params["bq"]).astype(f32)
    wk = perm_proj_w(params["wk"]).astype(f32); bk = perm_proj_b(params["bk"]).astype(f32)
    wv = perm_proj_w(params["wv"]).astype(f32); bv = perm_proj_b(params["bv"]).astype(f32)
    wm = perm_merge_w(params["wm"]).astype(f32); bm = params["bm"].reshape(D, 1).astype(f32)

    query = query.astype(f32); key = key.astype(f32); value = value.astype(f32)

    has_mask = mask is not None
    vmem_limit = _vmem_limit_bytes(D, N, M, H)

    batch_q = pl.BlockSpec((1, D, N), lambda b: (b, 0, 0))
    batch_kv = pl.BlockSpec((1, D, M), lambda b: (b, 0, 0))
    w_spec = pl.BlockSpec((D, D), lambda b: (0, 0))
    b_spec = pl.BlockSpec((D, 1), lambda b: (0, 0))

    weight_specs = [w_spec, b_spec, w_spec, b_spec, w_spec, b_spec, w_spec, b_spec]
    args = (query, key, value, wq, bq, wk, bk, wv, bv, wm, bm)
    in_specs = [batch_q, batch_kv, batch_kv] + weight_specs

    if has_mask:
        negmask = (~mask).astype(f32)                                      # (N, M)
        # pass 1: per-batch minimum of the raw scores; the global min is a
        # trivial jnp.min over B scalars outside the kernel.  The main pass
        # recomputes QK so no raw scores stay live between passes.
        min_flops = int(B * (2 * D * D * (N + M) + 2 * H * dim * N * M))
        min_bytes = int(4 * (B * D * (N + M) + 2 * D * D + 2 * D + B))
        per_batch_min = pl.pallas_call(
            functools.partial(_min_kernel, H),
            out_shape=jax.ShapeDtypeStruct((B, 1, 1), f32),
            grid=(B,),
            in_specs=[batch_q, batch_kv, w_spec, b_spec, w_spec, b_spec],
            out_specs=pl.BlockSpec((1, 1, 1), lambda b: (b, 0, 0)),
            compiler_params=pltpu.CompilerParams(
                dimension_semantics=("parallel",),
                vmem_limit_bytes=vmem_limit),
            cost_estimate=pl.CostEstimate(flops=min_flops, transcendentals=0,
                                          bytes_accessed=min_bytes),
        )(query, key, wq, bq, wk, bk)
        gmin = jnp.min(per_batch_min).reshape(1, 1).astype(f32)

        args = args + (negmask, gmin)
        in_specs = in_specs + [
            pl.BlockSpec((N, M), lambda b: (0, 0)),
            pl.BlockSpec(memory_space=pltpu.MemorySpace.SMEM),
        ]

    main_flops = int(B * (2 * D * D * (N + 2 * M) + 4 * H * dim * N * M
                          + 2 * D * D * N))
    main_bytes = int(4 * (B * D * (N + 2 * M) + 4 * D * D + 4 * D
                          + (N * M + 1 if has_mask else 0)
                          + B * (D * N + N * M)))

    kernel = functools.partial(_mha_kernel, H, has_mask, compute_dtype)
    out, smean = pl.pallas_call(
        kernel,
        out_shape=(jax.ShapeDtypeStruct((B, D, N), f32),
                   jax.ShapeDtypeStruct((B, N, M), f32)),
        grid=(B,),
        in_specs=in_specs,
        out_specs=(pl.BlockSpec((1, D, N), lambda b: (b, 0, 0)),
                   pl.BlockSpec((1, N, M), lambda b: (b, 0, 0))),
        compiler_params=pltpu.CompilerParams(
            dimension_semantics=("parallel",),
            vmem_limit_bytes=vmem_limit),
        cost_estimate=pl.CostEstimate(flops=main_flops,
                                      transcendentals=int(B * H * N * M),
                                      bytes_accessed=main_bytes),
    )(*args)
    return out, smean


def _ref_forward(query, key, value, mask, params, num_heads):
    """Pure-JAX reference mirroring the PyTorch forward exactly."""
    B, D, N = query.shape
    dim = D // num_heads

    def conv1d(w, b, x):   # 1x1 Conv1d on NCW input
        return jnp.einsum('oi,bin->bon', w, x) + b[None, :, None]

    q = conv1d(params["wq"], params["bq"], query).reshape(B, dim, num_heads, -1)
    k = conv1d(params["wk"], params["bk"], key).reshape(B, dim, num_heads, -1)
    v = conv1d(params["wv"], params["bv"], value).reshape(B, dim, num_heads, -1)
    scores = jnp.einsum('bdhn,bdhm->bhnm', q, k) / (dim ** 0.5)
    if mask is not None:
        scores = scores + (scores.min() - 20.0) * (~mask).astype(jnp.float32)[None, None]
    prob = jax.nn.softmax(scores, axis=-1)
    x = jnp.einsum('bhnm,bdhm->bdhn', prob, v)
    out = conv1d(params["wm"], params["bm"], x.reshape(B, D, -1))
    return out, scores.mean(axis=1)


if __name__ == "__main__":
    num_heads, d_model = 4, 32
    B, N = 2, 8

    key0 = jax.random.PRNGKey(0)
    kq, kk, kv, kw, kb, km = jax.random.split(key0, 6)

    # Deterministic Conv1d-style init; the module deep-copies `merge` into all
    # three projections, so all four convs start with identical parameters.
    bound = 1.0 / math.sqrt(d_model)
    w_merge = jax.random.uniform(kw, (d_model, d_model), jnp.float32, -bound, bound)
    b_merge = jax.random.uniform(kb, (d_model,), jnp.float32, -bound, bound)
    params = dict(wq=w_merge, bq=b_merge,
                  wk=w_merge, bk=b_merge,
                  wv=w_merge, bv=b_merge,
                  wm=w_merge, bm=b_merge)

    query = jax.random.normal(kq, (B, d_model, N), jnp.float32)
    key_t = jax.random.normal(kk, (B, d_model, N), jnp.float32)
    value = jax.random.normal(kv, (B, d_model, N), jnp.float32)
    mask = jax.random.bernoulli(km, 0.8, (N, N))   # bool (n, m), True = keep
    dist = None                                    # unused by the module

    # masked path (two-pass: per-batch min kernel + main kernel)
    out, smean = multi_headed_attention(query, key_t, value, dist, mask,
                                        params, num_heads)
    jax.block_until_ready((out, smean))
    ref_out, ref_smean = _ref_forward(query, key_t, value, mask, params, num_heads)
    assert out.shape == (B, d_model, N) and smean.shape == (B, N, N)
    assert jnp.allclose(out, ref_out, atol=2e-3, rtol=2e-3)
    assert jnp.allclose(smean, ref_smean, atol=2e-3, rtol=2e-3)

    # mask=None specialization (single pass, no min kernel, no mask math)
    out_nm, smean_nm = multi_headed_attention(query, key_t, value, dist, None,
                                              params, num_heads)
    jax.block_until_ready((out_nm, smean_nm))
    ref_out_nm, ref_smean_nm = _ref_forward(query, key_t, value, None,
                                            params, num_heads)
    assert jnp.allclose(out_nm, ref_out_nm, atol=2e-3, rtol=2e-3)
    assert jnp.allclose(smean_nm, ref_smean_nm, atol=2e-3, rtol=2e-3)

    print("KERNEL_OK")
</pallas_src>

<mosaic_0001>
module attributes {stable_mosaic.version = 11 : i64} {
  func.func @_min_kernel(%arg0: i32, %arg1: memref<1x32x8xf32, #tpu.memory_space<vmem>>, %arg2: memref<1x32x8xf32, #tpu.memory_space<vmem>>, %arg3: memref<32x32xf32, #tpu.memory_space<vmem>>, %arg4: memref<32x1xf32, #tpu.memory_space<vmem>>, %arg5: memref<32x32xf32, #tpu.memory_space<vmem>>, %arg6: memref<32x1xf32, #tpu.memory_space<vmem>>, %arg7: memref<1x1x1xf32, #tpu.memory_space<vmem>>) attributes {dimension_semantics = [#tpu.dimension_semantics<parallel>], iteration_bounds = array<i64: 2>, scalar_prefetch = 0 : i64, scratch_operands = 0 : i64, tpu.core_type = #tpu.core_type<tc>, window_params = [{transform_indices = @transform_0, window_bounds = array<i64: 1, 32, 8>}, {transform_indices = @transform_1, window_bounds = array<i64: 1, 32, 8>}, {pipeline_mode = #tpu.pipeline_mode<synchronous>, transform_indices = @transform_2, window_bounds = array<i64: 32, 32>}, {pipeline_mode = #tpu.pipeline_mode<synchronous>, transform_indices = @transform_3, window_bounds = array<i64: 32, 1>}, {pipeline_mode = #tpu.pipeline_mode<synchronous>, transform_indices = @transform_4, window_bounds = array<i64: 32, 32>}, {pipeline_mode = #tpu.pipeline_mode<synchronous>, transform_indices = @transform_5, window_bounds = array<i64: 32, 1>}, {transform_indices = @transform_6, window_bounds = array<i64: 1, 1, 1>}]} {
    %c0 = arith.constant 0 : index
    %c0_0 = arith.constant 0 : index
    %0 = vector.load %arg3[%c0, %c0_0] : memref<32x32xf32, #tpu.memory_space<vmem>>, vector<32x32xf32>
    %c0_1 = arith.constant 0 : index
    %c0_2 = arith.constant 0 : index
    %c0_3 = arith.constant 0 : index
    %1 = vector.load %arg1[%c0_1, %c0_2, %c0_3] : memref<1x32x8xf32, #tpu.memory_space<vmem>>, vector<1x32x8xf32>
    %2 = vector.shape_cast %1 : vector<1x32x8xf32> to vector<32x8xf32>
    %cst = arith.constant dense<0.000000e+00> : vector<32x8xf32>
    %3 = tpu.matmul %0, %2, %cst {dimension_numbers = #tpu.dot_dimension_numbers<[1], [0], [0], [1], [0, 0, 1, 1], [], []>} : vector<32x32xf32>, vector<32x8xf32>, vector<32x8xf32> -> vector<32x8xf32>
    %c0_4 = arith.constant 0 : index
    %c0_5 = arith.constant 0 : index
    %4 = vector.load %arg4[%c0_4, %c0_5] : memref<32x1xf32, #tpu.memory_space<vmem>>, vector<32x1xf32>
    %5 = vector.broadcast %4 : vector<32x1xf32> to vector<32x8xf32>
    %6 = arith.addf %3, %5 : vector<32x8xf32>
    %c0_6 = arith.constant 0 : index
    %c0_7 = arith.constant 0 : index
    %7 = vector.load %arg5[%c0_6, %c0_7] : memref<32x32xf32, #tpu.memory_space<vmem>>, vector<32x32xf32>
    %c0_8 = arith.constant 0 : index
    %c0_9 = arith.constant 0 : index
    %c0_10 = arith.constant 0 : index
    %8 = vector.load %arg2[%c0_8, %c0_9, %c0_10] : memref<1x32x8xf32, #tpu.memory_space<vmem>>, vector<1x32x8xf32>
    %9 = vector.shape_cast %8 : vector<1x32x8xf32> to vector<32x8xf32>
    %cst_11 = arith.constant dense<0.000000e+00> : vector<32x8xf32>
    %10 = tpu.matmul %7, %9, %cst_11 {dimension_numbers = #tpu.dot_dimension_numbers<[1], [0], [0], [1], [0, 0, 1, 1], [], []>} : vector<32x32xf32>, vector<32x8xf32>, vector<32x8xf32> -> vector<32x8xf32>
    %c0_12 = arith.constant 0 : index
    %c0_13 = arith.constant 0 : index
    %11 = vector.load %arg6[%c0_12, %c0_13] : memref<32x1xf32, #tpu.memory_space<vmem>>, vector<32x1xf32>
    %12 = vector.broadcast %11 : vector<32x1xf32> to vector<32x8xf32>
    %13 = arith.addf %10, %12 : vector<32x8xf32>
    %14 = vector.shape_cast %6 : vector<32x8xf32> to vector<4x8x8xf32>
    %15 = vector.shape_cast %13 : vector<32x8xf32> to vector<4x8x8xf32>
    %cst_14 = arith.constant dense<0.000000e+00> : vector<4x8x8xf32>
    %16 = tpu.matmul %14, %15, %cst_14 {dimension_numbers = #tpu.dot_dimension_numbers<[1], [1], [2], [2], [0, 0, 0, 2, 1, 2], [0], [0]>} : vector<4x8x8xf32>, vector<4x8x8xf32>, vector<4x8x8xf32> -> vector<4x8x8xf32>
    %cst_15 = arith.constant 0.353553385 : f32
    %17 = vector.broadcast %cst_15 : f32 to vector<4x8x8xf32>
    %18 = arith.mulf %16, %17 : vector<4x8x8xf32>
    %19 = vector.shape_cast %18 : vector<4x8x8xf32> to vector<1x4x8x8xf32>
    %cst_16 = arith.constant dense<0x7F800000> : vector<1xf32>
    %20 = vector.multi_reduction <minimumf>, %19, %cst_16 [1, 2, 3] : vector<1x4x8x8xf32> to vector<1xf32>
    %21 = vector.shape_cast %20 : vector<1xf32> to vector<1x1x1x1xf32>
    %22 = vector.extract %21[0, 0, 0, 0] : f32 from vector<1x1x1x1xf32>
    %23 = vector.broadcast %22 : f32 to vector<1x1x1xf32>
    %c0_17 = arith.constant 0 : index
    %c0_18 = arith.constant 0 : index
    %c0_19 = arith.constant 0 : index
    %24 = vector.load %arg7[%c0_17, %c0_18, %c0_19] : memref<1x1x1xf32, #tpu.memory_space<vmem>>, vector<1x1x1xf32>
    tpu.vector_store %arg7[%c0_17, %c0_18, %c0_19], %23 {strides = array<i32>} : memref<1x1x1xf32, #tpu.memory_space<vmem>>, vector<1x1x1xf32>,
    return
  }
  func.func @transform_0(%arg0: i32) -> (i32, i32, i32) {
    %c0_i32 = arith.constant 0 : i32
    %c0_i32_0 = arith.constant 0 : i32
    %c0_i32_1 = arith.constant 0 : i32
    return %arg0, %c0_i32, %c0_i32_0 : i32, i32, i32
  }
  func.func @transform_1(%arg0: i32) -> (i32, i32, i32) {
    %c0_i32 = arith.constant 0 : i32
    %c0_i32_0 = arith.constant 0 : i32
    %c0_i32_1 = arith.constant 0 : i32
    return %arg0, %c0_i32, %c0_i32_0 : i32, i32, i32
  }
  func.func @transform_2(%arg0: i32) -> (i32, i32) {
    %c0_i32 = arith.constant 0 : i32
    %c0_i32_0 = arith.constant 0 : i32
    %c0_i32_1 = arith.constant 0 : i32
    return %c0_i32, %c0_i32_0 : i32, i32
  }
  func.func @transform_3(%arg0: i32) -> (i32, i32) {
    %c0_i32 = arith.constant 0 : i32
    %c0_i32_0 = arith.constant 0 : i32
    %c0_i32_1 = arith.constant 0 : i32
    return %c0_i32, %c0_i32_0 : i32, i32
  }
  func.func @transform_4(%arg0: i32) -> (i32, i32) {
    %c0_i32 = arith.constant 0 : i32
    %c0_i32_0 = arith.constant 0 : i32
    %c0_i32_1 = arith.constant 0 : i32
    return %c0_i32, %c0_i32_0 : i32, i32
  }
  func.func @transform_5(%arg0: i32) -> (i32, i32) {
    %c0_i32 = arith.constant 0 : i32
    %c0_i32_0 = arith.constant 0 : i32
    %c0_i32_1 = arith.constant 0 : i32
    return %c0_i32, %c0_i32_0 : i32, i32
  }
  func.func @transform_6(%arg0: i32) -> (i32, i32, i32) {
    %c0_i32 = arith.constant 0 : i32
    %c0_i32_0 = arith.constant 0 : i32
    %c0_i32_1 = arith.constant 0 : i32
    return %arg0, %c0_i32, %c0_i32_0 : i32, i32, i32
  }
}

</mosaic_0001>

<bundles_post_ra>
// kernel: tpu_custom_call.1
= control target key start
LH: loop header
LB: loop body
LE: loop exit
PB: predicated region body
PF: predicated region fallthrough
CT: control target
= control target key end

     0   :  { %s1204_s21 = smov 0   ;;  %s1296_s0 = inlined_call_operand.vmem [shape: f32[2,32,8], index: 0, kind: input, shape index: {}]   ;;  %s1297_s1 = inlined_call_operand.vmem [shape: f32[2,32,8], index: 1, kind: input, shape index: {}]   ;;  %s1298_s2 = inlined_call_operand.vmem [shape: f32[32,32], index: 2, kind: input, shape index: {}]   ;;  %s1299_s3 = inlined_call_operand.vmem [shape: f32[32,1], index: 3, kind: input, shape index: {}]   ;;  %s1300_s4 = inlined_call_operand.vmem [shape: f32[32,32], index: 4, kind: input, shape index: {}]   ;;  %s1301_s5 = inlined_call_operand.vmem [shape: f32[32,1], index: 5, kind: input, shape index: {}]   ;;  %s1302_s6 = inlined_call_operand.vmem [shape: f32[2,1,1], index: 6, kind: output, shape index: {}]  }
   0x1 LB: > { %s1030_s22 = sadd.s32 4294967295, %s1164_s21   ;;  %p1034_p0 = scmp.ge.s32.totalorder %s1164_s21, 1  ;;  %s1164_s21 = sphi %s1204_s21, %s16_s21  }
   0x2   : > { %p222_p1 = scmp.lt.s32.totalorder %s1164_s21, 3 }
   0x4   : > { %p223_p2 = pnand %p1034_p0, %p222_p1 }
   0x5   : > { %p255_p3 = scmp.lt.s32.totalorder (!%p223_p2), %s1030_s22, 1  ;;  %v268_v0 = vld [vmem:[%s1298_s2] sm:$0xff] (!%p223_p2)  ;;  %vm300_vm0 = vcmask (!%p223_p2), 261120   ;;  %v1166_v2 = vmov (!%p223_p2), 0   ;;  %v278_v4 = vld [vmem:[%s1299_s3 + $0x10] sm:$0xff] (!%p223_p2)  ;;  %v277_v5 = vld [vmem:[%s1299_s3 + $0x8] sm:$0xff] (!%p223_p2) }
   0x6   : > { %226 = sbr.rel (%p223_p2) target bundleno = 804 (0x324), region = 44  ;;  %v398_v1 = vld [vmem:[%s1300_s4] sm:$0xff] (!%p223_p2)  ;;  %1087 = vmatprep.mubr.msk.f32.mxu0 (!%p223_p2), %vm300_vm0, %v268_v0  ;;  %1156 = vset.pattern.permute.xlu0 (!%p223_p2), %v1166_v2  ;;  %v279_v6 = vld [vmem:[%s1299_s3 + $0x18] sm:$0xff] (!%p223_p2)  ;;  %v407_v20 = vld [vmem:[%s1301_s5 + $0x8] sm:$0xff] (!%p223_p2)  ;;  %v1167_v29 = vmov (!%p223_p2), 0.0   ;;  %vm1168_vm1 = vmmov (!%p223_p2), 0  }
   0x7   : > { %1101 = vmatprep.mubr.msk.f32.mxu1 (!%p223_p2), %vm300_vm0, %v398_v1  ;;  %v276_v3 = vld [vmem:[%s1299_s3] sm:$0xff] (!%p223_p2)  ;;  %1157 = vset.pattern.permute.xlu1 (!%p223_p2), %v1166_v2  ;;  %v408_v21 = vld [vmem:[%s1301_s5 + $0x10] sm:$0xff] (!%p223_p2)  ;;  %v269_v22 = vld [vmem:[%s1298_s2 + $0x8] sm:$0xff] (!%p223_p2)  ;;  %vm559_vm2 = vcmask (!%p223_p2), 64512   ;;  %vm969_vm3 = vcmask (!%p223_p2), 0  }
   0x8   : > { %282 = vperm.xlu0 (!%p223_p2), %1156, %v276_v3   ;;  %292 = vperm.xlu1 (!%p223_p2), %1157, %v278_v4   ;;  %v406_v19 = vld [vmem:[%s1301_s5] sm:$0xff] (!%p223_p2)  ;;  %v409_v23 = vld [vmem:[%s1301_s5 + $0x18] sm:$0xff] (!%p223_p2)  ;;  %v399_v24 = vld [vmem:[%s1300_s4 + $0x8] sm:$0xff] (!%p223_p2) }
   0x9   : > { %v270_v25 = vld [vmem:[%s1298_s2 + $0x10] sm:$0xff] (!%p223_p2)  ;;  %v271_v27 = vld [vmem:[%s1298_s2 + $0x18] sm:$0xff] (!%p223_p2) }
   0xa   : > { %v400_v26 = vld [vmem:[%s1300_s4 + $0x10] sm:$0xff] (!%p223_p2)  ;;  %v401_v28 = vld [vmem:[%s1300_s4 + $0x18] sm:$0xff] (!%p223_p2) }
   0xc   : > { %287 = vperm.xlu0 (!%p223_p2), %1156, %v277_v5   ;;  %297 = vperm.xlu1 (!%p223_p2), %1157, %v279_v6  }
   0xd   : > { %s1304_s22 = smov (!%p255_p3, %s1030_s22), 1 }
   0xe   : > { %s1053_s7 = sshll.u32 %s1304_s22, 5  ;;  %s267_s18 = scalar_lea.vmem %s1302_s6, %s1304_s22 }
   0xf   : > { %s259_s12 = scalar_lea.vmem %s1296_s0, %s1053_s7  ;;  %s264_s15 = scalar_lea.vmem %s1297_s1, %s1053_s7 }
  0x10   : > { %v272_v7 = vld [vmem:[%s259_s12] sm:$0xff]  ;;  %v273_v8 = vld [vmem:[%s259_s12 + $0x8] sm:$0xff]  ;;  %v274_v12 = vld [vmem:[%s259_s12 + $0x10] sm:$0xff]  ;;  %412 = vperm.xlu0 %1156, %v406_v19   ;;  %417 = vperm.xlu1 %1157, %v407_v20  }
  0x11   : > { %v402_v9 = vld [vmem:[%s264_s15] sm:$0xff]  ;;  %v1127_v10 = vpack.c.bf16 %v273_v8, %v272_v7  ;;  %v403_v11 = vld [vmem:[%s264_s15 + $0x8] sm:$0xff]  ;;  %v275_v13 = vld [vmem:[%s259_s12 + $0x18] sm:$0xff] }
  0x12   : > { %v1135_v14 = vpack.c.bf16 %v403_v11, %v402_v9  ;;  %v1131_v15 = vpack.c.bf16 %v275_v13, %v274_v12  ;;  %v404_v16 = vld [vmem:[%s264_s15 + $0x10] sm:$0xff]  ;;  %v405_v17 = vld [vmem:[%s264_s15 + $0x18] sm:$0xff] }
  0x13   : > { %1128 = vmatprep.subr.bf16.mxu0 %v1127_v10  ;;  %v1139_v18 = vpack.c.bf16 %v405_v17, %v404_v16 }
  0x14   : > { %1136 = vmatprep.subr.bf16.mxu1 %v1135_v14  ;;  %1130 = vmatpush3.bf16.msra.mxu0 %v1127_v10 }
  0x15   : > { %1138 = vmatpush3.bf16.msra.mxu1 %v1135_v14  ;;  %1132 = vmatprep.subr.bf16.mxu0 %v1131_v15 }
  0x16   : > { %1140 = vmatprep.subr.bf16.mxu1 %v1139_v18  ;;  %422 = vperm.xlu0 %1156, %v408_v21  }
  0x17   : > { %427 = vperm.xlu1 %1157, %v409_v23  }
  0x18   : > { %1134 = vmatpush3.bf16.msra.mxu0 %v1131_v15 }
  0x19   : > { %1142 = vmatpush3.bf16.msra.mxu1 %v1139_v18  ;;  %1107 = vmatprep.subr.mxu0 %v1167_v29 }
  0x1a   : > { %1112 = vmatprep.subr.mxu1 %v1167_v29 }
  0x1b   : > { %1088 = vmatmul.mubr.msk.f32.vlgmr.msra.gmra.mrb[0].mxu0 %vm300_vm0, %v269_v22 }
  0x1c   : > { %1102 = vmatmul.mubr.msk.f32.vlgmr.msra.gmra.mrb[0].mxu1 %vm300_vm0, %v399_v24  ;;  %1090 = vmatprep.mubr.msk.f32.mxu0 %vm300_vm0, %v270_v25 }
  0x1d   : > { %1104 = vmatprep.mubr.msk.f32.mxu1 %vm300_vm0, %v400_v26 }
  0x1f   : > { %1091 = vmatmul.mubr.msk.f32.gmra.mrb[2].mxu0 %vm300_vm0, %v271_v27 }
  0x20   : > { %1105 = vmatmul.mubr.msk.f32.gmra.mrb[2].mxu1 %vm300_vm0, %v401_v28  ;;  %1109 = vmatprep.mubr.msk.f32.mxu0 %vm1168_vm1, %v1167_v29 }
  0x21   : > { %1114 = vmatprep.mubr.msk.f32.mxu1 %vm1168_vm1, %v1167_v29 }
  0x87   : > { %v293_v30 = vpop.permute.xlu1 %292  ;;  %v283_v31 = vpop.permute.xlu0 %282 }
  0x8b   : > { %v298_v32 = vpop.permute.xlu1 %297  ;;  %v288_v33 = vpop.permute.xlu0 %287 }
  0x8f   : > { %v418_v35 = vpop.permute.xlu1 %417  ;;  %v413_v39 = vpop.permute.xlu0 %412 }
  0x95   : > { %v423_v51 = vpop.permute.xlu0 %422 }
  0x96   : > { %v428_v50 = vpop.permute.xlu1 %427 }
  0xee   : > { %v1089_v34 = vpop.f32.mrb[0].mxu0 }
  0xef   : > { %v385_v36 = vadd.f32 %v1089_v34, %v288_v33  ;;  %v1103_v37 = vpop.f32.mrb[0].mxu1  ;;  %v379_v38 = vpop.f32.mrb[1].mxu0 }
  0xf0   : > { %v514_v40 = vadd.f32 %v1103_v37, %v418_v35  ;;  %v380_v41 = vadd.f32 %v379_v38, %v283_v31  ;;  %v508_v42 = vpop.f32.mrb[1].mxu1 }
  0xf1   : > { %v509_v43 = vadd.f32 %v508_v42, %v413_v39  ;;  %633 = vxpose.xlu1.b32.start.end [1/1] (short) (narrow) %v385_v36, 8 }
  0xf2   : > { %v1092_v44 = vpop.f32.mrb[2].mxu0  ;;  %527 = vxpose.xlu0.b32.start.end [1/1] (short) (narrow) %v380_v41, 8  ;;  %1113 = vmatpush3.msra.mxu1 %v514_v40 }
  0xf3   : > { %v1106_v45 = vpop.f32.mrb[2].mxu1  ;;  %1108 = vmatpush3.msra.mxu0 %v509_v43  ;;  %v389_v46 = vpop.f32.mrb[3].mxu0  ;;  %1122 = vmatprep.subr.mxu1 %v1167_v29  ;;  %v395_v49 = vadd.f32 %v1092_v44, %v298_v32 }
  0xf4   : > { %v390_v47 = vadd.f32 %v389_v46, %v293_v30  ;;  %v518_v48 = vpop.f32.mrb[3].mxu1  ;;  %1117 = vmatprep.subr.mxu0 %v1167_v29  ;;  %v524_v52 = vadd.f32 %v1106_v45, %v428_v50 }
  0xf5   : > { %v519_v54 = vadd.f32 %v518_v48, %v423_v51 }
  0xf6   : > { %738 = vxpose.xlu0.b32.start.end [1/1] (short) (narrow) %v390_v47, 8 }
  0xfa   : > { %843 = vxpose.xlu0.b32.start.end [1/1] (short) (narrow) %v395_v49, 8 }
 0x171   : > { %v649_v53 = vpop.trf.xlu1 }
 0x172   : > { %1115 = vmatmul.mubr.msk.f32.vlgmr.msra.gmra.mrb[4].mxu1 %vm559_vm2, %v649_v53  ;;  %v543_v55 = vpop.trf.xlu0 }
 0x173   : > { %1123 = vmatpush3.msra.mxu1 %v524_v52  ;;  %1110 = vmatmul.mubr.msk.f32.vlgmr.msra.gmra.mrb[4].mxu0 %vm559_vm2, %v543_v55 }
 0x174   : > { %1118 = vmatpush3.msra.mxu0 %v519_v54  ;;  %1119 = vmatprep.mubr.msk.f32.mxu0 %vm1168_vm1, %v1167_v29 }
 0x175   : > { %1124 = vmatprep.mubr.msk.f32.mxu1 %vm1168_vm1, %v1167_v29 }
 0x176   : > { %v754_v56 = vpop.trf.xlu0 }
 0x177   : > { %1120 = vmatmul.mubr.msk.f32.vlgmr.msra.gmra.mrb[6].mxu0 %vm559_vm2, %v754_v56 }
 0x17a   : > { %v859_v57 = vpop.trf.xlu0 }
 0x17b   : > { %1125 = vmatmul.mubr.msk.f32.vlgmr.msra.gmra.mrb[6].mxu1 %vm559_vm2, %v859_v57 }
 0x245   : > { %v734_v58 = vpop.f32.mrb[4].mxu1 }
 0x246   : > { %v629_v59 = vpop.f32.mrb[4].mxu0  ;;  %v949_v60 = vmul.f32 0.35355338, %v734_v58  ;;  %v1116_v61 = vpop.f32.mrb[5].mxu1 }
 0x247   : > { %v948_v62 = vmul.f32 0.35355338, %v629_v59  ;;  %v1111_v63 = vpop.f32.mrb[5].mxu0 }
 0x248   : > { %v953_v0 = vsel %vm559_vm2, %v949_v60, inf }
 0x249   : > { %v952_v1 = vsel %vm559_vm2, %v948_v62, inf }
 0x24a   : > { %v839_v2 = vpop.f32.mrb[6].mxu0  ;;  %v956_v3 = vmin.f32 %v952_v1, %v953_v0 }
 0x24b   : > { %v1121_v4 = vpop.f32.mrb[7].mxu0  ;;  %v950_v5 = vmul.f32 0.35355338, %v839_v2 }
 0x24d   : > { %v954_v9 = vsel %vm559_vm2, %v950_v5, inf }
 0x24e   : > { %v944_v6 = vpop.f32.mrb[6].mxu1 }
 0x24f   : > { %v951_v7 = vmul.f32 0.35355338, %v944_v6  ;;  %v1126_v8 = vpop.f32.mrb[7].mxu1 }
 0x251   : > { %v955_v10 = vsel %vm559_vm2, %v951_v7, inf }
 0x252   : > { %v957_v11 = vmin.f32 %v954_v9, %v955_v10 }
 0x254   : > { %v958_v12 = vmin.f32 %v956_v3, %v957_v11 }
 0x256   : > { %959 = vmin.xlane.f32.xlu0 %v958_v12 }
 0x2e3   : > { %v960_v13 = vpop.xlane.xlu0 %959 }
 0x2e4   : > { %v961_v14 = vrot.slane %v960_v13, 4 }
 0x2e6   : > { %v962_v15 = vmin.f32 %v960_v13, %v961_v14 }
 0x2e8   : > { %v963_v16 = vrot.slane %v962_v15, 2 }
 0x2ea   : > { %v964_v17 = vmin.f32 %v962_v15, %v963_v16 }
 0x2ec   : > { %v965_v18 = vrot.slane %v964_v17, 1 }
 0x2ee   : > { %v966_v19 = vmin.f32 %v964_v17, %v965_v18 }
 0x2f0   : > { %1143 = vpush %v966_v19 }
 0x321   : > { %s1144_s19 = spop %1143 }
 0x322   : > { %v968_v20 = vstv %s1144_s19 }
 0x323   : > { %970 = vst.msk [vmem:[%s267_s18] sm:$0x1] %vm969_vm3, %v968_v20 }
 0x324 PF: > { %s16_s21 = sadd.s32 1, %s1164_s21  }
 0x325   : > { %p13_p4 = scmp.ge.s32.totalorder %s16_s21, 4  }
 0x327   :  { %15 = sbr.rel (!%p13_p4) target bundleno = 1 (0x1), region = 77 }

</bundles_post_ra>
